<compile_context>
chip_gen: v6e
topology: v6e:2x2x1
jax: 0.10.0
libtpu: 0.0.40
codegen_flags: <defaults>
</compile_context>

<pallas_src>
import numpy as np
import jax
import jax.numpy as jnp
from jax import lax
from jax.experimental import pallas as pl
from jax.experimental.pallas import tpu as pltpu


MAX_TILE_B = 512                 # rows per grid step (multiple of 8 and 128)
_SMALL_VMEM_DEFAULT = 16 << 20   # smallest default scoped-VMEM limit (v5e)

_PREFER_VECTOR_GATHER = True     # flipped off if the gather lowering is unavailable


# ------------------------------ helpers -------------------------------------

def _round_up(x, m):
    return ((x + m - 1) // m) * m


def _choose_tile_b(batch):
    b8 = _round_up(max(batch, 1), 8)
    # Either one tile covering the whole (8-padded) batch, or 512-row tiles
    # (multiple of both 8 and 128, so all BlockSpec constraints hold).
    return b8 if b8 <= MAX_TILE_B else MAX_TILE_B


def _vmem_limit_bytes(table_bytes, out_tile_bytes, ids_tile_bytes, table_buffers):
    """Scoped-VMEM requirement from actual buffer counts (None = default is fine)."""
    need = (table_buffers * table_bytes
            + 2 * out_tile_bytes          # double-buffered output tile
            + 2 * ids_tile_bytes          # double-buffered ids tile
            + (1 << 20))                  # slack for compiler scratch
    if need <= _SMALL_VMEM_DEFAULT:
        return None
    try:
        cap = pltpu.get_tpu_info().vmem_capacity_bytes   # generation-aware (v7x: 64 MiB)
    except Exception:
        cap = 64 << 20
    # TODO(synk): if `need` exceeds `cap`, switch to the HBM row-gather path
    # instead of a VMEM-resident table.
    return int(min(need, cap - (2 << 20)))


# --------------------------- primary kernel ----------------------------------

def _vector_gather_kernel(ids_ref, table_ref, out_ref):
    # ids_ref:   VMEM int32 [tile_b, 1]   (this tile's row indices, one per sublane)
    # table_ref: VMEM f32   [N, D]        (whole table, resident, single-buffered)
    # out_ref:   VMEM f32   [tile_b, D]   (one dense lane/sublane-aligned block)
    tile_b, d = out_ref.shape
    idx2 = jnp.broadcast_to(ids_ref[...], (tile_b, d))     # lane-broadcast of indices
    # One vectorized sublane gather produces the whole dense (tile_b, D) block.
    out_ref[...] = jnp.take_along_axis(
        table_ref[...], idx2, axis=0,
        mode=lax.GatherScatterMode.PROMISE_IN_BOUNDS)


def _build_vector_gather(num_tiles, tile_b, n_rows, d, dtype, padded_b):
    itemsize = jnp.dtype(dtype).itemsize
    table_bytes = n_rows * d * itemsize
    out_tile_bytes = tile_b * d * itemsize
    ids_tile_bytes = tile_b * 4
    cost = pl.CostEstimate(
        flops=0, transcendentals=0,
        bytes_accessed=int(table_bytes + padded_b * d * itemsize + padded_b * 4))

    compiler_kwargs = dict(dimension_semantics=("arbitrary",))
    limit = _vmem_limit_bytes(table_bytes, out_tile_bytes, ids_tile_bytes,
                              table_buffers=1)
    if limit is not None:
        compiler_kwargs["vmem_limit_bytes"] = limit

    return pl.pallas_call(
        _vector_gather_kernel,
        out_shape=jax.ShapeDtypeStruct((padded_b, d), dtype),
        grid_spec=pltpu.PrefetchScalarGridSpec(
            num_scalar_prefetch=0,
            grid=(num_tiles,),
            in_specs=[
                # Row indices for this tile: normal blocked VMEM input.
                pl.BlockSpec((tile_b, 1), lambda i: (i, 0)),
                # Whole table, constant index_map; revisited every step, so
                # single-buffer it instead of the default double-buffering.
                pl.BlockSpec((n_rows, d), lambda i: (0, 0),
                             pipeline_mode=pl.Buffered(1)),
            ],
            out_specs=pl.BlockSpec((tile_b, d), lambda i: (i, 0)),
        ),
        compiler_params=pltpu.CompilerParams(**compiler_kwargs),
        cost_estimate=cost,
    )


# --------------------------- fallback kernel ---------------------------------
# Only used if the vectorized sublane gather does not lower on the local
# toolchain. Known-good pattern: scalar-prefetched ids in SMEM + per-row
# dynamic sublane slices of the resident table.

def _make_fallback_kernel(tile_b):
    def kernel(ids_ref, table_ref, out_ref):
        # ids_ref:   SMEM int32 [padded_b]   (scalar prefetch)
        # table_ref: VMEM f32   [N, D]
        # out_ref:   VMEM f32   [tile_b, D]
        base = pl.program_id(0) * tile_b

        def body(r, carry):
            out_ref[pl.ds(r, 1), :] = table_ref[pl.ds(ids_ref[base + r], 1), :]
            return carry

        lax.fori_loop(0, tile_b, body, 0, unroll=(tile_b <= 32))
    return kernel


def _build_fallback_gather(num_tiles, tile_b, n_rows, d, dtype, padded_b):
    itemsize = jnp.dtype(dtype).itemsize
    table_bytes = n_rows * d * itemsize
    out_tile_bytes = tile_b * d * itemsize
    cost = pl.CostEstimate(
        flops=0, transcendentals=0,
        bytes_accessed=int(table_bytes + padded_b * d * itemsize + padded_b * 4))

    compiler_kwargs = dict(dimension_semantics=("arbitrary",))
    limit = _vmem_limit_bytes(table_bytes, out_tile_bytes, 0, table_buffers=2)
    if limit is not None:
        compiler_kwargs["vmem_limit_bytes"] = limit

    return pl.pallas_call(
        _make_fallback_kernel(tile_b),
        out_shape=jax.ShapeDtypeStruct((padded_b, d), dtype),
        grid_spec=pltpu.PrefetchScalarGridSpec(
            num_scalar_prefetch=1,                        # ids land in SMEM
            grid=(num_tiles,),
            in_specs=[pl.BlockSpec((n_rows, d), lambda i, ids: (0, 0))],
            out_specs=pl.BlockSpec((tile_b, d), lambda i, ids: (i, 0)),
        ),
        compiler_params=pltpu.CompilerParams(**compiler_kwargs),
        cost_estimate=cost,
    )


# ------------------------------ wrapper --------------------------------------

def embedding_lookup(ids, table):
    """Gather rows `table[ids]` with a Pallas TPU kernel.

    ids:   int32 [B]  (already label-encoded, values in [0, N))
    table: [N, D]
    returns [B, D] in table's dtype.
    """
    global _PREFER_VECTOR_GATHER
    ids = ids.astype(jnp.int32)
    b = int(ids.shape[0])
    n_rows, d = table.shape

    tile_b = _choose_tile_b(b)
    padded_b = _round_up(b, tile_b)
    num_tiles = padded_b // tile_b
    if padded_b != b:
        # Pad with a valid index (0); padded rows are sliced off below.
        ids = jnp.concatenate(
            [ids, jnp.zeros((padded_b - b,), dtype=jnp.int32)], axis=0)

    if _PREFER_VECTOR_GATHER:
        try:
            call = _build_vector_gather(num_tiles, tile_b, n_rows, d,
                                        table.dtype, padded_b)
            out = call(ids.reshape(padded_b, 1), table)
            return out[:b]
        except Exception:
            # Vectorized sublane gather not supported here; use the per-row path.
            _PREFER_VECTOR_GATHER = False

    call = _build_fallback_gather(num_tiles, tile_b, n_rows, d,
                                  table.dtype, padded_b)
    out = call(ids, table)
    return out[:b]


# ------------------------------ MovieModel -----------------------------------

class MovieModelPallas:
    """Pallas port of MovieModel: LabelEncoder.fit/transform + nn.Embedding."""

    def __init__(self, embedding_dim, movie_ids, key, table_dtype=jnp.float32):
        movie_ids = jnp.asarray(movie_ids, dtype=jnp.int32)
        # LabelEncoder().fit(movie_ids): classes_ = sorted unique ids.
        self.classes = jnp.sort(jnp.unique(movie_ids))
        # Original module: num_embeddings = len(transform(movie_ids)) = len(movie_ids)
        # (>= len(classes), so every transformed index is in range).
        num_embeddings = int(movie_ids.shape[0])
        # torch.nn.Embedding default init: N(0, 1).
        # table_dtype=jnp.bfloat16 halves HBM traffic / VMEM footprint of this
        # purely memory-bound gather; default float32 matches torch semantics.
        self.weight = jax.random.normal(
            key, (num_embeddings, embedding_dim), dtype=jnp.float32
        ).astype(table_dtype)

    def label_transform(self, x):
        # LabelEncoder.transform: id -> index in sorted classes_ (plain-JAX glue).
        # TODO(synk): sklearn raises on unseen labels; we clip into range instead,
        # so an out-of-vocabulary id returns a valid-but-arbitrary embedding row.
        idx = jnp.searchsorted(self.classes, jnp.asarray(x, dtype=jnp.int32))
        return jnp.clip(idx, 0, self.classes.shape[0] - 1).astype(jnp.int32)

    def __call__(self, x):
        idx = self.label_transform(x)
        return embedding_lookup(idx, self.weight)


# -------------------------------- main ---------------------------------------

if __name__ == "__main__":
    key = jax.random.PRNGKey(0)
    k_emb, k_x = jax.random.split(key)

    EMBEDDING_DIM = 128          # lane-aligned embedding dim
    NUM_MOVIES = 16
    BATCH = 8

    # Deterministic "catalog" of movie ids (arbitrary, non-contiguous ints).
    movie_ids = np.arange(NUM_MOVIES, dtype=np.int32) * 7 + 100   # 100, 107, ...

    model = MovieModelPallas(EMBEDDING_DIM, movie_ids, k_emb)

    # A batch of raw movie ids drawn (deterministically) from the catalog.
    pick = jax.random.randint(k_x, (BATCH,), 0, NUM_MOVIES)
    x = jnp.asarray(movie_ids)[pick]

    out = model(x)
    out = jax.block_until_ready(out)

    # Reference check: plain-JAX gather must match the Pallas gather exactly.
    ref = model.weight[model.label_transform(x)]
    assert out.shape == (BATCH, EMBEDDING_DIM)
    np.testing.assert_allclose(np.asarray(out), np.asarray(ref), rtol=0, atol=0)

    print("KERNEL_OK")
</pallas_src>

<mosaic_0001>
module attributes {stable_mosaic.version = 11 : i64} {
  func.func @_vector_gather_kernel(%arg0: i32, %arg1: memref<8x1xi32, #tpu.memory_space<vmem>>, %arg2: memref<16x128xf32, #tpu.memory_space<vmem>>, %arg3: memref<8x128xf32, #tpu.memory_space<vmem>>) attributes {dimension_semantics = [#tpu.dimension_semantics<arbitrary>], iteration_bounds = array<i64: 1>, scalar_prefetch = 0 : i64, scratch_operands = 0 : i64, tpu.core_type = #tpu.core_type<tc>, window_params = [{transform_indices = @transform_0, window_bounds = array<i64: 8, 1>}, {pipeline_mode = #tpu.pipeline_mode<synchronous>, transform_indices = @transform_1, window_bounds = array<i64: 16, 128>}, {transform_indices = @transform_2, window_bounds = array<i64: 8, 128>}]} {
    %c0 = arith.constant 0 : index
    %c0_0 = arith.constant 0 : index
    %0 = vector.load %arg1[%c0, %c0_0] : memref<8x1xi32, #tpu.memory_space<vmem>>, vector<8x1xi32>
    %1 = vector.shape_cast %0 : vector<8x1xi32> to vector<8x1xi32>
    %2 = vector.broadcast %1 : vector<8x1xi32> to vector<8x128xi32>
    %c0_1 = arith.constant 0 : index
    %c0_2 = arith.constant 0 : index
    %3 = vector.load %arg2[%c0_1, %c0_2] : memref<16x128xf32, #tpu.memory_space<vmem>>, vector<16x128xf32>
    %c0_i32 = arith.constant 0 : i32
    %4 = vector.broadcast %c0_i32 : i32 to vector<8x128xi32>
    %5 = arith.cmpi slt, %2, %4 : vector<8x128xi32>
    %c16_i32 = arith.constant 16 : i32
    %6 = vector.broadcast %c16_i32 : i32 to vector<8x128xi32>
    %7 = arith.addi %2, %6 : vector<8x128xi32>
    %8 = arith.select %5, %7, %2 : vector<8x128xi1>, vector<8x128xi32>
    %9 = vector.shape_cast %8 : vector<8x128xi32> to vector<8x128x1xi32>
    %10 = vector.shape_cast %9 : vector<8x128x1xi32> to vector<8x128xi32>
    %11 = tpu.dynamic_gather %3[%10] in [0] : vector<16x128xf32>, vector<8x128xi32> -> vector<8x128xf32>
    %c0_3 = arith.constant 0 : index
    %c0_4 = arith.constant 0 : index
    %12 = vector.load %arg3[%c0_3, %c0_4] : memref<8x128xf32, #tpu.memory_space<vmem>>, vector<8x128xf32>
    tpu.vector_store %arg3[%c0_3, %c0_4], %11 {strides = array<i32>} : memref<8x128xf32, #tpu.memory_space<vmem>>, vector<8x128xf32>,
    return
  }
  func.func @transform_0(%arg0: i32) -> (i32, i32) {
    %c0_i32 = arith.constant 0 : i32
    %c0_i32_0 = arith.constant 0 : i32
    return %arg0, %c0_i32 : i32, i32
  }
  func.func @transform_1(%arg0: i32) -> (i32, i32) {
    %c0_i32 = arith.constant 0 : i32
    %c0_i32_0 = arith.constant 0 : i32
    %c0_i32_1 = arith.constant 0 : i32
    return %c0_i32, %c0_i32_0 : i32, i32
  }
  func.func @transform_2(%arg0: i32) -> (i32, i32) {
    %c0_i32 = arith.constant 0 : i32
    %c0_i32_0 = arith.constant 0 : i32
    return %arg0, %c0_i32 : i32, i32
  }
}

module attributes {stable_mosaic.version = 11 : i64} {
  func.func @kernel(%arg0: i32, %arg1: memref<8xi32, #tpu.memory_space<smem>>, %arg2: memref<16x128xf32, #tpu.memory_space<vmem>>, %arg3: memref<8x128xf32, #tpu.memory_space<vmem>>) attributes {dimension_semantics = [#tpu.dimension_semantics<arbitrary>], iteration_bounds = array<i64: 1>, scalar_prefetch = 1 : i64, scratch_operands = 0 : i64, tpu.core_type = #tpu.core_type<tc>, window_params = [{pipeline_mode = #tpu.pipeline_mode<synchronous>, transform_indices = @transform_0, window_bounds = array<i64: 16, 128>}, {transform_indices = @transform_1, window_bounds = array<i64: 8, 128>}]} {
    %c8_i32 = arith.constant 8 : i32
    %0 = arith.muli %arg0, %c8_i32 : i32
    %c0_i32 = arith.constant 0 : i32
    %1 = arith.addi %0, %c0_i32 : i32
    %2 = arith.index_cast %1 : i32 to index
    %3 = memref.load %arg1[%2] : memref<8xi32, #tpu.memory_space<smem>>
    %4 = arith.index_cast %3 : i32 to index
    %c0 = arith.constant 0 : index
    %5 = vector.load %arg2[%4, %c0] : memref<16x128xf32, #tpu.memory_space<vmem>>, vector<1x128xf32>
    %6 = arith.index_cast %c0_i32 : i32 to index
    %c0_0 = arith.constant 0 : index
    %7 = vector.load %arg3[%6, %c0_0] : memref<8x128xf32, #tpu.memory_space<vmem>>, vector<1x128xf32>
    tpu.vector_store %arg3[%6, %c0_0], %5 {strides = array<i32>} : memref<8x128xf32, #tpu.memory_space<vmem>>, vector<1x128xf32>,
    %c1_i32 = arith.constant 1 : i32
    %8 = arith.addi %0, %c1_i32 : i32
    %9 = arith.index_cast %8 : i32 to index
    %10 = memref.load %arg1[%9] : memref<8xi32, #tpu.memory_space<smem>>
    %11 = arith.index_cast %10 : i32 to index
    %c0_1 = arith.constant 0 : index
    %12 = vector.load %arg2[%11, %c0_1] : memref<16x128xf32, #tpu.memory_space<vmem>>, vector<1x128xf32>
    %13 = arith.index_cast %c1_i32 : i32 to index
    %c0_2 = arith.constant 0 : index
    %14 = vector.load %arg3[%13, %c0_2] : memref<8x128xf32, #tpu.memory_space<vmem>>, vector<1x128xf32>
    tpu.vector_store %arg3[%13, %c0_2], %12 {strides = array<i32>} : memref<8x128xf32, #tpu.memory_space<vmem>>, vector<1x128xf32>,
    %c2_i32 = arith.constant 2 : i32
    %15 = arith.addi %0, %c2_i32 : i32
    %16 = arith.index_cast %15 : i32 to index
    %17 = memref.load %arg1[%16] : memref<8xi32, #tpu.memory_space<smem>>
    %18 = arith.index_cast %17 : i32 to index
    %c0_3 = arith.constant 0 : index
    %19 = vector.load %arg2[%18, %c0_3] : memref<16x128xf32, #tpu.memory_space<vmem>>, vector<1x128xf32>
    %20 = arith.index_cast %c2_i32 : i32 to index
    %c0_4 = arith.constant 0 : index
    %21 = vector.load %arg3[%20, %c0_4] : memref<8x128xf32, #tpu.memory_space<vmem>>, vector<1x128xf32>
    tpu.vector_store %arg3[%20, %c0_4], %19 {strides = array<i32>} : memref<8x128xf32, #tpu.memory_space<vmem>>, vector<1x128xf32>,
    %c3_i32 = arith.constant 3 : i32
    %22 = arith.addi %0, %c3_i32 : i32
    %23 = arith.index_cast %22 : i32 to index
    %24 = memref.load %arg1[%23] : memref<8xi32, #tpu.memory_space<smem>>
    %25 = arith.index_cast %24 : i32 to index
    %c0_5 = arith.constant 0 : index
    %26 = vector.load %arg2[%25, %c0_5] : memref<16x128xf32, #tpu.memory_space<vmem>>, vector<1x128xf32>
    %27 = arith.index_cast %c3_i32 : i32 to index
    %c0_6 = arith.constant 0 : index
    %28 = vector.load %arg3[%27, %c0_6] : memref<8x128xf32, #tpu.memory_space<vmem>>, vector<1x128xf32>
    tpu.vector_store %arg3[%27, %c0_6], %26 {strides = array<i32>} : memref<8x128xf32, #tpu.memory_space<vmem>>, vector<1x128xf32>,
    %c4_i32 = arith.constant 4 : i32
    %29 = arith.addi %0, %c4_i32 : i32
    %30 = arith.index_cast %29 : i32 to index
    %31 = memref.load %arg1[%30] : memref<8xi32, #tpu.memory_space<smem>>
    %32 = arith.index_cast %31 : i32 to index
    %c0_7 = arith.constant 0 : index
    %33 = vector.load %arg2[%32, %c0_7] : memref<16x128xf32, #tpu.memory_space<vmem>>, vector<1x128xf32>
    %34 = arith.index_cast %c4_i32 : i32 to index
    %c0_8 = arith.constant 0 : index
    %35 = vector.load %arg3[%34, %c0_8] : memref<8x128xf32, #tpu.memory_space<vmem>>, vector<1x128xf32>
    tpu.vector_store %arg3[%34, %c0_8], %33 {strides = array<i32>} : memref<8x128xf32, #tpu.memory_space<vmem>>, vector<1x128xf32>,
    %c5_i32 = arith.constant 5 : i32
    %36 = arith.addi %0, %c5_i32 : i32
    %37 = arith.index_cast %36 : i32 to index
    %38 = memref.load %arg1[%37] : memref<8xi32, #tpu.memory_space<smem>>
    %39 = arith.index_cast %38 : i32 to index
    %c0_9 = arith.constant 0 : index
    %40 = vector.load %arg2[%39, %c0_9] : memref<16x128xf32, #tpu.memory_space<vmem>>, vector<1x128xf32>
    %41 = arith.index_cast %c5_i32 : i32 to index
    %c0_10 = arith.constant 0 : index
    %42 = vector.load %arg3[%41, %c0_10] : memref<8x128xf32, #tpu.memory_space<vmem>>, vector<1x128xf32>
    tpu.vector_store %arg3[%41, %c0_10], %40 {strides = array<i32>} : memref<8x128xf32, #tpu.memory_space<vmem>>, vector<1x128xf32>,
    %c6_i32 = arith.constant 6 : i32
    %43 = arith.addi %0, %c6_i32 : i32
    %44 = arith.index_cast %43 : i32 to index
    %45 = memref.load %arg1[%44] : memref<8xi32, #tpu.memory_space<smem>>
    %46 = arith.index_cast %45 : i32 to index
    %c0_11 = arith.constant 0 : index
    %47 = vector.load %arg2[%46, %c0_11] : memref<16x128xf32, #tpu.memory_space<vmem>>, vector<1x128xf32>
    %48 = arith.index_cast %c6_i32 : i32 to index
    %c0_12 = arith.constant 0 : index
    %49 = vector.load %arg3[%48, %c0_12] : memref<8x128xf32, #tpu.memory_space<vmem>>, vector<1x128xf32>
    tpu.vector_store %arg3[%48, %c0_12], %47 {strides = array<i32>} : memref<8x128xf32, #tpu.memory_space<vmem>>, vector<1x128xf32>,
    %c7_i32 = arith.constant 7 : i32
    %50 = arith.addi %0, %c7_i32 : i32
    %51 = arith.index_cast %50 : i32 to index
    %52 = memref.load %arg1[%51] : memref<8xi32, #tpu.memory_space<smem>>
    %53 = arith.index_cast %52 : i32 to index
    %c0_13 = arith.constant 0 : index
    %54 = vector.load %arg2[%53, %c0_13] : memref<16x128xf32, #tpu.memory_space<vmem>>, vector<1x128xf32>
    %55 = arith.index_cast %c7_i32 : i32 to index
    %c0_14 = arith.constant 0 : index
    %56 = vector.load %arg3[%55, %c0_14] : memref<8x128xf32, #tpu.memory_space<vmem>>, vector<1x128xf32>
    tpu.vector_store %arg3[%55, %c0_14], %54 {strides = array<i32>} : memref<8x128xf32, #tpu.memory_space<vmem>>, vector<1x128xf32>,
    %c8_i32_15 = arith.constant 8 : i32
    return
  }
  func.func @transform_0(%arg0: i32, %arg1: memref<8xi32, #tpu.memory_space<smem>>) -> (i32, i32) {
    %c0_i32 = arith.constant 0 : i32
    %c0_i32_0 = arith.constant 0 : i32
    %c0_i32_1 = arith.constant 0 : i32
    return %c0_i32, %c0_i32_0 : i32, i32
  }
  func.func @transform_1(%arg0: i32, %arg1: memref<8xi32, #tpu.memory_space<smem>>) -> (i32, i32) {
    %c0_i32 = arith.constant 0 : i32
    %c0_i32_0 = arith.constant 0 : i32
    return %arg0, %c0_i32 : i32, i32
  }
}

</mosaic_0001>

<bundles_post_ra>
// kernel: tpu_custom_call.1
= control target key start
LH: loop header
LB: loop body
LE: loop exit
PB: predicated region body
PF: predicated region fallthrough
CT: control target
= control target key end

     0   :  { %s157_s9 = smov [#allocation3]   ;;  %s186_s0 = inlined_call_operand.hbm [shape: s32[8], index: 0, kind: input, shape index: {}]   ;;  %s187_s1 = inlined_call_operand.hbm [shape: f32[16,128], index: 1, kind: input, shape index: {}]   ;;  %s188_s2 = inlined_call_operand.hbm [shape: f32[8,128], index: 2, kind: output, shape index: {}]  }
   0x1   :  { %8 = dma.hbm_to_smem %s186_s0, 16, %s157_s9, [#allocation2] }
   0x2   :  { %151 = dma.done.wait [#allocation2], 16 }
   0x3   :  { %152 = vsyncadd [#allocation2], 4294967280 }
   0x4   :  { %10 = sfence }
   0x5   :  { %11 = vsyncpa [#allocation5], 0 }
   0x6   :  { %12 = vsyncpa [#allocation6], 0  ;;  %s158_s12 = smov [#allocation4]  }
   0x7   :  { %s18_s13 = sshll.u32 %s158_s12, 4  ;;  %s19_s13 = int_to_ptr.vmem [resolvable:$true] %s18_s13 }
   0x8   :  { %s119_s14 = scalar_lea.vmem %s19_s13, 256  ;;  %p124_p1 = scmp.lt.s32.totalorder %s19_s13, %s19_s13 }
   0x9   :  { %p120_p0 = scmp.ne.s32.totalorder %s19_s13, %s119_s14  ;;  %p125_p2 = scmp.lt.s32.totalorder %s119_s14, %s119_s14 }
   0xb   :  { %p126_p3 = por %p125_p2, %p124_p1 }
   0xd   :  { %p127_p4 = pnand %p126_p3, %p120_p0 }
   0xf   :  { %130 = shalt.err (!%p127_p4)
}
  0x10   :  { %s159_s15 = smov 128   ;;  %s160_s16 = smov 8  }
  0x11   :  { %24 = dma.hbm_to_vmem [thread:$0]  %s187_s1, 256, %s19_s13, [#allocation5], %s159_s15, %s159_s15, %s160_s16  }
  0x12   :  { %153 = dma.done.wait [#allocation5], 256  }
  0x13   :  { %154 = vsyncadd [#allocation5], 4294967040  ;;  %s29_s0 = sld [smem:[#allocation3]]  ;;  %s161_s29 = smov [#allocation7]  }
  0x14   :  { %s91_s19 = sld [smem:[#allocation3 + $0x1]]  ;;  %s74_s30 = sshll.u32 %s161_s29, 4  ;;  %s75_s30 = int_to_ptr.vmem [resolvable:$true] %s74_s30 }
  0x15   :  { %s92_s20 = sld [smem:[#allocation3 + $0x2]]  ;;  %s131_s7 = scalar_lea.vmem %s75_s30, 128 }
  0x16   :  { %s93_s21 = sld [smem:[#allocation3 + $0x3]]  ;;  %p132_p5 = scmp.ne.s32.totalorder %s75_s30, %s131_s7 }
  0x17   :  { %s94_s22 = sld [smem:[#allocation3 + $0x4]]  ;;  %p136_p6 = scmp.lt.s32.totalorder %s75_s30, %s75_s30 }
  0x18   :  { %s95_s23 = sld [smem:[#allocation3 + $0x5]]  ;;  %p137_p7 = scmp.lt.s32.totalorder %s131_s7, %s131_s7 }
  0x19   :  { %s96_s24 = sld [smem:[#allocation3 + $0x6]]  ;;  %s30_s25 = scalar_lea.vmem [#allocation4], %s29_s0 }
  0x1a   :  { %v31_v0 = vld [vmem:[%s30_s25] sm:$0x1]  ;;  %s97_s26 = sld [smem:[#allocation3 + $0x7]]  ;;  %s35_s27 = scalar_lea.vmem [#allocation4], %s91_s19 }
  0x1b   :  { %32 = vst [vmem:[#allocation7] sm:$0x1] %v31_v0  ;;  %v36_v1 = vld [vmem:[%s35_s27] sm:$0x1]  ;;  %s40_s28 = scalar_lea.vmem [#allocation4], %s92_s20  ;;  %p138_p8 = por %p137_p7, %p136_p6 }
  0x1c   :  { %37 = vst [vmem:[#allocation7 + $0x1] sm:$0x1] %v36_v1  ;;  %v41_v2 = vld [vmem:[%s40_s28] sm:$0x1]  ;;  %s45_s1 = scalar_lea.vmem [#allocation4], %s93_s21 }
  0x1d   :  { %42 = vst [vmem:[#allocation7 + $0x2] sm:$0x1] %v41_v2  ;;  %v46_v3 = vld [vmem:[%s45_s1] sm:$0x1]  ;;  %s50_s3 = scalar_lea.vmem [#allocation4], %s94_s22  ;;  %p139_p9 = pnand %p138_p8, %p132_p5 }
  0x1e   :  { %47 = vst [vmem:[#allocation7 + $0x3] sm:$0x1] %v46_v3  ;;  %v51_v4 = vld [vmem:[%s50_s3] sm:$0x1]  ;;  %s55_s4 = scalar_lea.vmem [#allocation4], %s95_s23 }
  0x1f   :  { %52 = vst [vmem:[#allocation7 + $0x4] sm:$0x1] %v51_v4  ;;  %v56_v5 = vld [vmem:[%s55_s4] sm:$0x1]  ;;  %s60_s5 = scalar_lea.vmem [#allocation4], %s96_s24 }
  0x20   :  { %57 = vst [vmem:[#allocation7 + $0x5] sm:$0x1] %v56_v5  ;;  %v61_v6 = vld [vmem:[%s60_s5] sm:$0x1]  ;;  %s65_s6 = scalar_lea.vmem [#allocation4], %s97_s26 }
  0x21   :  { %62 = vst [vmem:[#allocation7 + $0x6] sm:$0x1] %v61_v6  ;;  %v66_v7 = vld [vmem:[%s65_s6] sm:$0x1] }
  0x22   :  { %67 = vst [vmem:[#allocation7 + $0x7] sm:$0x1] %v66_v7 }
  0x23   :  { %142 = shalt.err (!%p139_p9)
}
  0x24   :  { %77 = dma.vmem_to_hbm [thread:$0]  %s75_s30, 128, %s188_s2, [#allocation6]  }
  0x25   :  { %155 = dma.done.wait [#allocation6], 128  }
  0x26   :  { %156 = vsyncadd [#allocation6], 4294967168 }
  0x27   :  { %81 = vsyncpa [#allocation5], 1 }
  0x28   :  { %82 = vsyncpa [#allocation6], 1 }

</bundles_post_ra>
